<compile_context>
chip_gen: v7x
topology: tpu7x:2x2x1
jax: 0.10.0
libtpu: 0.0.40
codegen_flags: <defaults>
</compile_context>

<pallas_src>
import jax
import jax.numpy as jnp
from jax.experimental import pallas as pl
from jax.experimental.pallas import tpu as pltpu


# --- dependent function from the reference module (not on the traced path) --
def vecmul(l):
    ret = 1
    for i in l:
        ret *= i
    return ret


shapes = []                       # model generator declared no layer shapes
P = shapes
a = [vecmul(x) for x in P]        # -> [] (kept for fidelity with the source)
layer_in_block_list = []          # empty in the source -> forward == identity


def _hbm_copy_kernel(x_hbm, o_hbm, sem):
    # Single direct HBM->HBM DMA.  No VMEM staging, no grid, no masked stores:
    # the DMA engine handles arbitrary shapes/dtypes at full bandwidth.
    cp = pltpu.make_async_copy(x_hbm, o_hbm, sem)
    cp.start()
    cp.wait()


def _pallas_hbm_copy(x):
    """Materialize a fresh copy of `x` via one HBM->HBM DMA."""
    return pl.pallas_call(
        _hbm_copy_kernel,
        out_shape=jax.ShapeDtypeStruct(x.shape, x.dtype),
        in_specs=[pl.BlockSpec(memory_space=pl.ANY)],
        out_specs=pl.BlockSpec(memory_space=pl.ANY),
        scratch_shapes=[pltpu.SemaphoreType.DMA],
    )(x)


class ServerModel:
    """JAX/Pallas port of the PyTorch ServerModel (empty layer list)."""

    def __init__(self):
        # The reference layer list is empty -> no parameters to initialize.
        self.layers = list(layer_in_block_list)

    def forward(self, X, k, materialize=False):
        # NOTE: `k` must be a concrete Python int (matches the PyTorch
        # module's Python-level control flow; the branch is static here).
        if k == 0:
            for i, layer in enumerate(self.layers):
                X = layer(X)
        else:
            for i, layer in enumerate(self.layers):
                if i >= k:
                    X = layer(X)

        # The layer list is empty, so forward is the identity.  The fastest
        # correct implementation is to not launch anything (zero HBM traffic,
        # zero launch overhead).  A fresh buffer is produced only on request,
        # via a single HBM->HBM DMA.
        if not materialize:
            return X
        return _pallas_hbm_copy(X)

    __call__ = forward


if __name__ == "__main__":
    key = jax.random.PRNGKey(0)
    # Small NCHW input consistent with the module's conv-style usage.
    X = jax.random.normal(key, (2, 4, 16, 16), dtype=jnp.float32)

    model = ServerModel()

    # Default (and recommended) path: pure identity, no kernel launch.
    out_k0 = jax.block_until_ready(model(X, k=0))

    # Exercise the Pallas HBM->HBM DMA copy kernel once (materialized output).
    out_k1 = jax.block_until_ready(model(X, k=1, materialize=True))

    assert out_k0.shape == X.shape and out_k0.dtype == X.dtype
    assert out_k1.shape == X.shape and out_k1.dtype == X.dtype
    assert jnp.allclose(out_k0, X)
    assert jnp.allclose(out_k1, X)

    print("KERNEL_OK")
</pallas_src>

<mosaic_0001>
module attributes {stable_mosaic.version = 11 : i64} {
  func.func @_hbm_copy_kernel(%arg0: memref<2x4x16x16xf32, #tpu.memory_space<any>>, %arg1: memref<2x4x16x16xf32, #tpu.memory_space<any>>, %arg2: memref<!tpu.dma_semaphore, #tpu.memory_space<semaphore_mem>>) attributes {dimension_semantics = [], scalar_prefetch = 0 : i64, scratch_operands = 1 : i64, tpu.core_type = #tpu.core_type<tc>} {
    tpu.enqueue_dma source(%arg0 : memref<2x4x16x16xf32, #tpu.memory_space<any>>) target(%arg1 : memref<2x4x16x16xf32, #tpu.memory_space<any>>) target_semaphore(%arg2 : memref<!tpu.dma_semaphore, #tpu.memory_space<semaphore_mem>>)
    tpu.wait_dma2 semaphore(%arg2 : memref<!tpu.dma_semaphore, #tpu.memory_space<semaphore_mem>>) src(%arg0 : memref<2x4x16x16xf32, #tpu.memory_space<any>>) dst(%arg1 : memref<2x4x16x16xf32, #tpu.memory_space<any>>)
    return
  }
}

</mosaic_0001>

<bundles_post_ra>
// kernel: tpu_custom_call.1
= control target key start
LH: loop header
LB: loop body
LE: loop exit
PB: predicated region body
PF: predicated region fallthrough
CT: control target
= control target key end

     0   :  { %s36_s6 = smov [#allocation2]   ;;  %s37_s7 = smov [#allocation3]   ;;  %s55_s0 = inlined_call_operand.hbm [shape: f32[2,4,16,16], index: 0, kind: input, shape index: {}]   ;;  %s56_s1 = inlined_call_operand.hbm [shape: f32[2,4,16,16], index: 1, kind: output, shape index: {}]  }
   0x1   :  { %s38_s8 = smov 0  }
   0x2   :  { %18 = dma.general %s55_s0, 2048, %s56_s1, %s36_s6, %s37_s7, [#allocation4], %s38_s8, 0  }
   0x3   :  { %34 = dma.done.wait [#allocation2], 2048 }
   0x4   :  { %35 = vsyncadd [#allocation2], 4294965248 }
   0x5   :  { %24 = vsyncmov [#allocation2] }
   0x8   :  { %s25_s13 = vpop.sfrf %24 }
   0x9   :  { %p30_p0 = scmp.ne.s32.totalorder %s25_s13, 0 }
   0xb   :  { %29 = shalt.err (%p30_p0)  }

</bundles_post_ra>
